<compile_context>
chip_gen: v7x
topology: tpu7x:2x2x1
jax: 0.10.0
libtpu: 0.0.40
codegen_flags: <defaults>
</compile_context>

<pallas_src>
import jax
import jax.numpy as jnp
from jax import lax
from jax.experimental import pallas as pl
from jax.experimental.pallas import tpu as pltpu


def _make_clip_kernel(share_exp):
    """share_exp: trace-time flag; reuse exp(logits - m_c) for the row path."""

    def kernel(text_ref, label_ref, partial_ref, m_ref, s_ref):
        c = pl.program_id(0)            # core (parallel) axis
        j = pl.program_id(1)            # column-tile (reduction) axis
        n_j = pl.num_programs(1)
        tn = label_ref.shape[0]

        # ---- per-core init at the first column tile.
        @pl.when(j == 0)
        def _init():
            partial_ref[...] = jnp.zeros(partial_ref.shape, partial_ref.dtype)
            m_ref[...] = jnp.full(m_ref.shape, -jnp.inf, m_ref.dtype)
            s_ref[...] = jnp.zeros(s_ref.shape, s_ref.dtype)

        # ---- logits tile [B, tn]: bf16 operands, f32 accumulation on the MXU.
        t = text_ref[...]               # (B, D)  bf16, unit rows * logit_scale
        l = label_ref[...]              # (tn, D) bf16, unit rows
        logits = lax.dot_general(
            t, l,
            dimension_numbers=(((1,), (1,)), ((), ())),
            preferred_element_type=jnp.float32)             # (B, tn) f32

        # ---- diagonal entries of this tile: global rows row0 .. row0 + tn.
        row0 = pl.multiple_of((c * n_j + j) * tn, tn)
        t_rows = text_ref[pl.ds(row0, tn), :].astype(jnp.float32)   # (tn, D)
        d = jnp.sum(t_rows * l.astype(jnp.float32),
                    axis=-1, keepdims=True)                  # (tn, 1), scale folded

        # ---- label (column) loss: exact per tile (all B rows present here).
        m_c = jnp.max(logits, axis=0, keepdims=True)                        # (1, tn)
        e = jnp.exp(logits - m_c)                                           # (B, tn)
        col_lse = jnp.log(jnp.sum(e, axis=0, keepdims=True)) + m_c          # (1, tn)
        # diag shows up once in the row loss and once in the column loss -> -2*sum(d)
        partial_ref[...] += jnp.sum(col_lse) - 2.0 * jnp.sum(d)

        # ---- text (row) loss: online logsumexp carried in the per-core outputs.
        m_prev = m_ref[0]                                                   # (B, 1)
        m_new = jnp.maximum(m_prev, jnp.max(logits, axis=-1, keepdims=True))
        if share_exp:
            # sum_c exp(logits - m_new) == exp(-m_new) * sum_c e * exp(m_c);
            # safe while 2*|max logit| stays well below the f32 exp overflow (~88).
            p = e * jnp.exp(m_c)                                            # exp(logits)
            tile_sum = jnp.sum(p, axis=-1, keepdims=True) * jnp.exp(-m_new)
        else:
            tile_sum = jnp.sum(jnp.exp(logits - m_new), axis=-1, keepdims=True)
        s_ref[0] = s_ref[0] * jnp.exp(m_prev - m_new) + tile_sum
        m_ref[0] = m_new

    return kernel


def _vmem_cap_bytes():
    try:
        return int(pltpu.get_tpu_info().vmem_capacity_bytes) * 7 // 8
    except Exception:  # conservative fallback if the query is unavailable
        return 100 * 1024 * 1024


def _pick_col_tile(batch):
    # 256 keeps the v6e/v7x 256-wide MXU fed while bounding per-step (B, tn)
    # temporaries on v7x's smaller VMEM; 128 matches v5e's MXU width.
    for cand in (256, 128):
        if batch % cand == 0:
            return cand
    return batch  # toy sizes: single tile


def clip_loss(text_features, label_features, logit_scale=None, *,
              col_tile=None, num_cores=None):
    """CLIPLoss.forward: returns a scalar float32 loss."""
    B, D = text_features.shape
    assert label_features.shape == (B, D)
    assert B % 8 == 0, "batch must be a multiple of 8 (TPU sublane tiling)"

    if col_tile is None:
        col_tile = _pick_col_tile(B)
    assert B % col_tile == 0 and (col_tile % 8 == 0 or col_tile == B)
    n_tiles = B // col_tile

    if num_cores is None:
        # v7x has 2 TensorCores per chip; a 2-way parallel split is a harmless
        # serial loop on v5e/v6e (1 TC).
        num_cores = 2 if n_tiles % 2 == 0 else 1
    assert n_tiles % num_cores == 0
    tiles_per_core = n_tiles // num_cores

    # TODO(synk): the `_logit_scale` sub-module is modeled as multiplication by a
    # fixed scalar (CLIP-style exp(log(1/0.07))).
    scale = 1.0 if logit_scale is None else float(logit_scale)
    share_exp = (2.0 * abs(scale)) < 80.0   # keep separate exps if scale ~ CLIP clamp 100

    # One O(B*D) wrapper pass (negligible vs O(B^2*D) kernel compute): normalize,
    # fold the scale into the text rows, cast to bf16 for the MXU.
    t = text_features.astype(jnp.float32)
    t = t * lax.rsqrt(jnp.sum(t * t, axis=-1, keepdims=True))
    t = (t * scale).astype(jnp.bfloat16)
    l = label_features.astype(jnp.float32)
    l = l * lax.rsqrt(jnp.sum(l * l, axis=-1, keepdims=True))
    l = l.astype(jnp.bfloat16)

    # VMEM budget: resident bf16 text + double-buffered bf16 label tile + lane-
    # padded per-core row state + (B, tn) logits/exp temporaries, ~30% headroom.
    need = int(1.3 * (2 * B * D * 2 + 2 * col_tile * D * 2
                      + 6 * B * col_tile * 4 + 4 * 512 * B)) + (4 << 20)
    vmem_limit = max(min(need, _vmem_cap_bytes()), 16 << 20)

    partial, m_out, s_out = pl.pallas_call(
        _make_clip_kernel(share_exp),
        out_shape=(
            jax.ShapeDtypeStruct((num_cores, 1, 1), jnp.float32),  # per-core col partial
            jax.ShapeDtypeStruct((num_cores, B, 1), jnp.float32),  # per-core row max
            jax.ShapeDtypeStruct((num_cores, B, 1), jnp.float32),  # per-core row sumexp
        ),
        grid_spec=pltpu.PrefetchScalarGridSpec(
            num_scalar_prefetch=0,
            grid=(num_cores, tiles_per_core),
            in_specs=[
                # text: resident bf16 block (constant index map)
                pl.BlockSpec((B, D), lambda c, j: (0, 0)),
                # label: streamed bf16 column tiles (default double buffer is enough;
                # the tile DMA is tiny vs the B*tn*D matmul)
                pl.BlockSpec((col_tile, D),
                             lambda c, j: (c * tiles_per_core + j, 0)),
            ],
            out_specs=(
                pl.BlockSpec((1, 1, 1), lambda c, j: (c, 0, 0)),
                pl.BlockSpec((1, B, 1), lambda c, j: (c, 0, 0)),
                pl.BlockSpec((1, B, 1), lambda c, j: (c, 0, 0)),
            ),
        ),
        compiler_params=pltpu.CompilerParams(
            dimension_semantics=("parallel", "arbitrary"),
            vmem_limit_bytes=vmem_limit,
        ),
    )(t, l)

    # Cheap O(B) cross-core merge of the online row logsumexp, then final scaling.
    m_all = m_out[..., 0]                                  # (num_cores, B)
    s_all = s_out[..., 0]
    m_g = jnp.max(m_all, axis=0)                           # (B,)
    s_g = jnp.sum(s_all * jnp.exp(m_all - m_g[None, :]), axis=0)
    row_lse_sum = jnp.sum(m_g + jnp.log(s_g))
    return (jnp.sum(partial) + row_lse_sum) / (2.0 * B)


if __name__ == "__main__":
    key = jax.random.PRNGKey(0)
    k_text, k_label = jax.random.split(key)

    B, D = 64, 32
    text_features = jax.random.normal(k_text, (B, D), dtype=jnp.float32)
    label_features = jax.random.normal(k_label, (B, D), dtype=jnp.float32)

    # Deterministic logit scale (CLIP default: exp(log(1/0.07)) ~= 14.29).
    logit_scale = float(jnp.exp(jnp.log(1.0 / 0.07)))

    # col_tile=16, num_cores=2 -> 2 column tiles per core: exercises the online
    # row logsumexp, the per-tile column loss, and the cross-core combine.
    loss = clip_loss(text_features, label_features, logit_scale,
                     col_tile=16, num_cores=2)
    jax.block_until_ready(loss)

    # Pure-JAX f32 reference (same math as the PyTorch module).
    t = text_features / jnp.linalg.norm(text_features, axis=-1, keepdims=True)
    l = label_features / jnp.linalg.norm(label_features, axis=-1, keepdims=True)
    logits = logit_scale * (t @ l.T)
    lab = jnp.arange(B)
    ce_r = jnp.mean(jax.nn.logsumexp(logits, axis=-1) - logits[lab, lab])
    ce_c = jnp.mean(jax.nn.logsumexp(logits.T, axis=-1) - logits[lab, lab])
    ref = (ce_r + ce_c) / 2.0

    # bf16 MXU operands -> tolerance loosened vs the f32 reference (per review).
    assert jnp.allclose(loss, ref, atol=5e-2, rtol=5e-2), (float(loss), float(ref))
    print("KERNEL_OK")
</pallas_src>

<mosaic_0001>
module attributes {stable_mosaic.version = 11 : i64} {
  func.func @kernel(%arg0: i32, %arg1: i32, %arg2: memref<64x32xbf16, #tpu.memory_space<vmem>>, %arg3: memref<16x32xbf16, #tpu.memory_space<vmem>>, %arg4: memref<1x1x1xf32, #tpu.memory_space<vmem>>, %arg5: memref<1x64x1xf32, #tpu.memory_space<vmem>>, %arg6: memref<1x64x1xf32, #tpu.memory_space<vmem>>) attributes {dimension_semantics = [#tpu.dimension_semantics<parallel>, #tpu.dimension_semantics<arbitrary>], iteration_bounds = array<i64: 2, 2>, scalar_prefetch = 0 : i64, scratch_operands = 0 : i64, tpu.core_type = #tpu.core_type<tc>, window_params = [{pipeline_mode = #tpu.pipeline_mode<synchronous>, transform_indices = @transform_0, window_bounds = array<i64: 64, 32>}, {transform_indices = @transform_1, window_bounds = array<i64: 16, 32>}, {transform_indices = @transform_2, window_bounds = array<i64: 1, 1, 1>}, {transform_indices = @transform_3, window_bounds = array<i64: 1, 64, 1>}, {transform_indices = @transform_4, window_bounds = array<i64: 1, 64, 1>}]} {
    %c0_i32 = arith.constant 0 : i32
    %0 = arith.cmpi eq, %arg1, %c0_i32 : i32
    %1 = arith.extui %0 : i1 to i32
    %c0_i32_0 = arith.constant 0 : i32
    %2 = arith.cmpi ne, %1, %c0_i32_0 : i32
    scf.if %2 {
      %cst_32 = arith.constant 0.000000e+00 : f32
      %66 = vector.broadcast %cst_32 : f32 to vector<1x1x1xf32>
      %c0_33 = arith.constant 0 : index
      %c0_34 = arith.constant 0 : index
      %c0_35 = arith.constant 0 : index
      %67 = vector.load %arg4[%c0_33, %c0_34, %c0_35] : memref<1x1x1xf32, #tpu.memory_space<vmem>>, vector<1x1x1xf32>
      tpu.vector_store %arg4[%c0_33, %c0_34, %c0_35], %66 {strides = array<i32>} : memref<1x1x1xf32, #tpu.memory_space<vmem>>, vector<1x1x1xf32>,
      %cst_36 = arith.constant 0xFF800000 : f32
      %68 = vector.broadcast %cst_36 : f32 to vector<1x64x1xf32>
      %c0_37 = arith.constant 0 : index
      %c0_38 = arith.constant 0 : index
      %c0_39 = arith.constant 0 : index
      %69 = vector.load %arg5[%c0_37, %c0_38, %c0_39] : memref<1x64x1xf32, #tpu.memory_space<vmem>>, vector<1x64x1xf32>
      tpu.vector_store %arg5[%c0_37, %c0_38, %c0_39], %68 {strides = array<i32>} : memref<1x64x1xf32, #tpu.memory_space<vmem>>, vector<1x64x1xf32>,
      %cst_40 = arith.constant 0.000000e+00 : f32
      %70 = vector.broadcast %cst_40 : f32 to vector<1x64x1xf32>
      %c0_41 = arith.constant 0 : index
      %c0_42 = arith.constant 0 : index
      %c0_43 = arith.constant 0 : index
      %71 = vector.load %arg6[%c0_41, %c0_42, %c0_43] : memref<1x64x1xf32, #tpu.memory_space<vmem>>, vector<1x64x1xf32>
      tpu.vector_store %arg6[%c0_41, %c0_42, %c0_43], %70 {strides = array<i32>} : memref<1x64x1xf32, #tpu.memory_space<vmem>>, vector<1x64x1xf32>,
    } else {
    }
    %c0 = arith.constant 0 : index
    %c0_1 = arith.constant 0 : index
    %3 = vector.load %arg2[%c0, %c0_1] : memref<64x32xbf16, #tpu.memory_space<vmem>>, vector<64x32xbf16>
    %c0_2 = arith.constant 0 : index
    %c0_3 = arith.constant 0 : index
    %4 = vector.load %arg3[%c0_2, %c0_3] : memref<16x32xbf16, #tpu.memory_space<vmem>>, vector<16x32xbf16>
    %cst = arith.constant dense<0.000000e+00> : vector<64x16xf32>
    %5 = tpu.matmul %3, %4, %cst {dimension_numbers = #tpu.dot_dimension_numbers<[1], [1], [0], [0], [0, 0, 1, 0], [], []>} : vector<64x32xbf16>, vector<16x32xbf16>, vector<64x16xf32> -> vector<64x16xf32>
    %c2_i32 = arith.constant 2 : i32
    %6 = arith.muli %arg0, %c2_i32 : i32
    %7 = arith.addi %6, %arg1 : i32
    %c16_i32 = arith.constant 16 : i32
    %8 = arith.muli %7, %c16_i32 : i32
    %9 = tpu.assume_multiple %8, 16 : i32
    %10 = arith.index_cast %9 : i32 to index
    %c0_4 = arith.constant 0 : index
    %11 = vector.load %arg2[%10, %c0_4] : memref<64x32xbf16, #tpu.memory_space<vmem>>, vector<16x32xbf16>
    %12 = arith.extf %11 : vector<16x32xbf16> to vector<16x32xf32>
    %13 = arith.extf %4 : vector<16x32xbf16> to vector<16x32xf32>
    %14 = arith.mulf %12, %13 : vector<16x32xf32>
    %cst_5 = arith.constant dense<0.000000e+00> : vector<16xf32>
    %15 = vector.multi_reduction <add>, %14, %cst_5 [1] : vector<16x32xf32> to vector<16xf32>
    %16 = vector.shape_cast %15 : vector<16xf32> to vector<16x1xf32>
    %cst_6 = arith.constant dense<0xFF800000> : vector<16xf32>
    %17 = vector.multi_reduction <maximumf>, %5, %cst_6 [0] : vector<64x16xf32> to vector<16xf32>
    %18 = vector.shape_cast %17 : vector<16xf32> to vector<1x16xf32>
    %19 = vector.broadcast %18 : vector<1x16xf32> to vector<64x16xf32>
    %20 = arith.subf %5, %19 : vector<64x16xf32>
    %21 = math.exp %20 : vector<64x16xf32>
    %cst_7 = arith.constant dense<0.000000e+00> : vector<16xf32>
    %22 = vector.multi_reduction <add>, %21, %cst_7 [0] : vector<64x16xf32> to vector<16xf32>
    %23 = vector.shape_cast %22 : vector<16xf32> to vector<1x16xf32>
    %24 = math.log %23 : vector<1x16xf32>
    %25 = arith.addf %24, %18 : vector<1x16xf32>
    %c0_8 = arith.constant 0 : index
    %c0_9 = arith.constant 0 : index
    %c0_10 = arith.constant 0 : index
    %26 = vector.load %arg4[%c0_8, %c0_9, %c0_10] : memref<1x1x1xf32, #tpu.memory_space<vmem>>, vector<1x1x1xf32>
    %27 = vector.shape_cast %25 : vector<1x16xf32> to vector<1x1x16xf32>
    %cst_11 = arith.constant dense<0.000000e+00> : vector<1xf32>
    %28 = vector.multi_reduction <add>, %27, %cst_11 [1, 2] : vector<1x1x16xf32> to vector<1xf32>
    %29 = vector.shape_cast %28 : vector<1xf32> to vector<1x1x1xf32>
    %30 = vector.extract %29[0, 0, 0] : f32 from vector<1x1x1xf32>
    %31 = vector.shape_cast %16 : vector<16x1xf32> to vector<1x16x1xf32>
    %cst_12 = arith.constant dense<0.000000e+00> : vector<1xf32>
    %32 = vector.multi_reduction <add>, %31, %cst_12 [1, 2] : vector<1x16x1xf32> to vector<1xf32>
    %33 = vector.shape_cast %32 : vector<1xf32> to vector<1x1x1xf32>
    %34 = vector.extract %33[0, 0, 0] : f32 from vector<1x1x1xf32>
    %cst_13 = arith.constant 2.000000e+00 : f32
    %35 = arith.mulf %cst_13, %34 : f32
    %36 = arith.subf %30, %35 : f32
    %37 = vector.broadcast %36 : f32 to vector<1x1x1xf32>
    %38 = arith.addf %26, %37 : vector<1x1x1xf32>
    %c0_14 = arith.constant 0 : index
    %c0_15 = arith.constant 0 : index
    %c0_16 = arith.constant 0 : index
    %39 = vector.load %arg4[%c0_14, %c0_15, %c0_16] : memref<1x1x1xf32, #tpu.memory_space<vmem>>, vector<1x1x1xf32>
    tpu.vector_store %arg4[%c0_14, %c0_15, %c0_16], %38 {strides = array<i32>} : memref<1x1x1xf32, #tpu.memory_space<vmem>>, vector<1x1x1xf32>,
    %c0_17 = arith.constant 0 : index
    %c0_18 = arith.constant 0 : index
    %c0_19 = arith.constant 0 : index
    %40 = vector.load %arg5[%c0_17, %c0_18, %c0_19] : memref<1x64x1xf32, #tpu.memory_space<vmem>>, vector<1x64x1xf32>
    %41 = vector.shape_cast %40 : vector<1x64x1xf32> to vector<64x1xf32>
    %cst_20 = arith.constant dense<0xFF800000> : vector<64xf32>
    %42 = vector.multi_reduction <maximumf>, %5, %cst_20 [1] : vector<64x16xf32> to vector<64xf32>
    %43 = vector.shape_cast %42 : vector<64xf32> to vector<64x1xf32>
    %44 = arith.maximumf %41, %43 : vector<64x1xf32>
    %45 = math.exp %18 : vector<1x16xf32>
    %46 = vector.broadcast %45 : vector<1x16xf32> to vector<64x16xf32>
    %47 = arith.mulf %21, %46 : vector<64x16xf32>
    %cst_21 = arith.constant dense<0.000000e+00> : vector<64xf32>
    %48 = vector.multi_reduction <add>, %47, %cst_21 [1] : vector<64x16xf32> to vector<64xf32>
    %49 = vector.shape_cast %48 : vector<64xf32> to vector<64x1xf32>
    %cst_22 = arith.constant 0.000000e+00 : f32
    %50 = vector.broadcast %cst_22 : f32 to vector<64x1xf32>
    %51 = arith.subf %50, %44 : vector<64x1xf32>
    %52 = math.exp %51 : vector<64x1xf32>
    %53 = arith.mulf %49, %52 : vector<64x1xf32>
    %c0_23 = arith.constant 0 : index
    %c0_24 = arith.constant 0 : index
    %c0_25 = arith.constant 0 : index
    %54 = vector.load %arg6[%c0_23, %c0_24, %c0_25] : memref<1x64x1xf32, #tpu.memory_space<vmem>>, vector<1x64x1xf32>
    %55 = vector.shape_cast %54 : vector<1x64x1xf32> to vector<64x1xf32>
    %56 = arith.subf %41, %44 : vector<64x1xf32>
    %57 = math.exp %56 : vector<64x1xf32>
    %58 = arith.mulf %55, %57 : vector<64x1xf32>
    %59 = arith.addf %58, %53 : vector<64x1xf32>
    %c0_26 = arith.constant 0 : index
    %c0_27 = arith.constant 0 : index
    %c0_28 = arith.constant 0 : index
    %60 = vector.load %arg6[%c0_26, %c0_27, %c0_28] : memref<1x64x1xf32, #tpu.memory_space<vmem>>, vector<1x64x1xf32>
    %61 = vector.shape_cast %60 : vector<1x64x1xf32> to vector<64x1xf32>
    %62 = vector.shape_cast %59 : vector<64x1xf32> to vector<1x64x1xf32>
    tpu.vector_store %arg6[%c0_26, %c0_27, %c0_28], %62 {strides = array<i32>} : memref<1x64x1xf32, #tpu.memory_space<vmem>>, vector<1x64x1xf32>,
    %c0_29 = arith.constant 0 : index
    %c0_30 = arith.constant 0 : index
    %c0_31 = arith.constant 0 : index
    %63 = vector.load %arg5[%c0_29, %c0_30, %c0_31] : memref<1x64x1xf32, #tpu.memory_space<vmem>>, vector<1x64x1xf32>
    %64 = vector.shape_cast %63 : vector<1x64x1xf32> to vector<64x1xf32>
    %65 = vector.shape_cast %44 : vector<64x1xf32> to vector<1x64x1xf32>
    tpu.vector_store %arg5[%c0_29, %c0_30, %c0_31], %65 {strides = array<i32>} : memref<1x64x1xf32, #tpu.memory_space<vmem>>, vector<1x64x1xf32>,
    return
  }
  func.func @transform_0(%arg0: i32, %arg1: i32) -> (i32, i32) {
    %c0_i32 = arith.constant 0 : i32
    %c0_i32_0 = arith.constant 0 : i32
    %c0_i32_1 = arith.constant 0 : i32
    return %c0_i32, %c0_i32_0 : i32, i32
  }
  func.func @transform_1(%arg0: i32, %arg1: i32) -> (i32, i32) {
    %c2_i32 = arith.constant 2 : i32
    %0 = arith.muli %arg0, %c2_i32 : i32
    %1 = arith.addi %0, %arg1 : i32
    %c0_i32 = arith.constant 0 : i32
    %c0_i32_0 = arith.constant 0 : i32
    return %1, %c0_i32 : i32, i32
  }
  func.func @transform_2(%arg0: i32, %arg1: i32) -> (i32, i32, i32) {
    %c0_i32 = arith.constant 0 : i32
    %c0_i32_0 = arith.constant 0 : i32
    %c0_i32_1 = arith.constant 0 : i32
    return %arg0, %c0_i32, %c0_i32_0 : i32, i32, i32
  }
  func.func @transform_3(%arg0: i32, %arg1: i32) -> (i32, i32, i32) {
    %c0_i32 = arith.constant 0 : i32
    %c0_i32_0 = arith.constant 0 : i32
    %c0_i32_1 = arith.constant 0 : i32
    return %arg0, %c0_i32, %c0_i32_0 : i32, i32, i32
  }
  func.func @transform_4(%arg0: i32, %arg1: i32) -> (i32, i32, i32) {
    %c0_i32 = arith.constant 0 : i32
    %c0_i32_0 = arith.constant 0 : i32
    %c0_i32_1 = arith.constant 0 : i32
    return %arg0, %c0_i32, %c0_i32_0 : i32, i32, i32
  }
}

</mosaic_0001>

<bundles_post_ra>
// kernel: tpu_custom_call.1
= control target key start
LH: loop header
LB: loop body
LE: loop exit
PB: predicated region body
PF: predicated region fallthrough
CT: control target
= control target key end

     0   :  { %s1022_s15 = smov 0   ;;  %s1024_s16 = smov 0   ;;  %s1254_s0 = inlined_call_operand.vmem [shape: bf16[64,32], index: 0, kind: input, shape index: {}]   ;;  %s1255_s1 = inlined_call_operand.vmem [shape: bf16[64,32], index: 1, kind: input, shape index: {}]   ;;  %s1256_s2 = inlined_call_operand.vmem [shape: f32[2,1,1], index: 2, kind: output, shape index: {0}]   ;;  %s1257_s3 = inlined_call_operand.vmem [shape: f32[2,64,1], index: 3, kind: output, shape index: {1}]   ;;  %s1258_s4 = inlined_call_operand.vmem [shape: f32[2,64,1], index: 4, kind: output, shape index: {2}]  }
   0x1   :  { %s1026_s17 = smov 0   ;;  %s1028_s18 = smov 0  }
   0x2   :  { %s1030_s19 = smov 0  }
   0x3 LB: > { %s24_s20 = sadd.s32 1, %s985_s17  ;;  %s27_s21 = sadd.s32 1, %s989_s18  ;;  %s993_s19 = sphi %s1030_s19, %s15_s19   ;;  %s989_s18 = sphi %s1028_s18, %s1262_s18   ;;  %s985_s17 = sphi %s1026_s17, %s1261_s17   ;;  %s981_s16 = sphi %s1024_s16, %s1260_s16   ;;  %s977_s15 = sphi %s1022_s15, %s1259_s15  }
   0x4   : > { %p25_p0 = scmp.ge.s32.totalorder %s24_s20, 2  ;;  %p803_p1 = scmp.ge.s32.totalorder %s993_s19, 1 }
   0x5   : > { %p188_p2 = scmp.lt.s32.totalorder %s993_s19, 5 }
   0x6   : > { %s1264_s20 = smov (%p25_p0, %s24_s20), 0  ;;  %s1266_s21 = smov (!%p25_p0, %s27_s21), %s989_s18 }
   0x7   : > { %p189_p3 = pnand %p803_p1, %p188_p2  ;;  %p29_p4 = scmp.ge.s32.totalorder %s1266_s21, 2 }
   0x8   : > { %s804_s22 = sshll.u32 (!%p189_p3), %s981_s16, 1  ;;  %p234_p5 = scmp.lt.s32.totalorder (!%p189_p3), %s981_s16, 1 }
   0x9   : > { %s1268_s21 = smov (%p29_p4, %s1266_s21), 0  ;;  %192 = sbr.rel (%p189_p3) target bundleno = 545 (0x221), region = 28 }
   0xa   : > { %s1055_s23 = sadd.s32 (!%p189_p3), %s977_s15, %s804_s22  ;;  %p811_p7 = scmp.ne.s32.totalorder (!%p189_p3), %s977_s15, 0 }
   0xb   : > { %s805_s24 = sshll.u32 (!%p189_p3), %s1055_s23, 1 }
   0xc   : > { %p227_p6 = scmp.lt.s32.totalorder (!%p189_p3), %s805_s24, 7 }
  0x10   : > { %s1270_s16 = smov (!%p234_p5, %s981_s16), 1  ;;  %s1272_s24 = smov (!%p227_p6, %s805_s24), 7 }
  0x11   : > { %s1061_s27 = scalar_lea.vmem %s1256_s2, %s1270_s16  ;;  %s826_s28 = sshll.u32 %s1270_s16, 6  ;;  %vm252_vm0 = vcmask (!%p811_p7), 0   ;;  %vm254_vm1 = vcmask (!%p811_p7), 7168   ;;  %v995_v0 = vmov (!%p811_p7), 0.0   ;;  %v996_v1 = vmov (!%p811_p7), -inf  }
  0x12   : > { %s806_s29 = sshll.u32 %s1272_s24, 2  ;;  %s1066_s6 = scalar_lea.vmem %s1257_s3, %s826_s28  ;;  %253 = vst.msk [vmem:[%s1061_s27] sm:$0x1] (!%p811_p7), %vm252_vm0, %v995_v0 }
  0x13   : > { %s230_s9 = scalar_lea.vmem %s1255_s1, %s806_s29  ;;  %s1074_s12 = scalar_lea.vmem %s1258_s4, %s826_s28  ;;  %255 = vst.msk [vmem:[%s1066_s6] sm:$0xff] (!%p811_p7), %vm254_vm1, %v996_v1  ;;  %256 = vst.msk [vmem:[%s1066_s6 + $0x8] sm:$0xff] (!%p811_p7), %vm254_vm1, %v996_v1 }
  0x14   : > { %251 = sbr.rel (%p811_p7) target bundleno = 27 (0x1b), region = 32  ;;  %257 = vst.msk [vmem:[%s1066_s6 + $0x10] sm:$0xff] (!%p811_p7), %vm254_vm1, %v996_v1  ;;  %258 = vst.msk [vmem:[%s1066_s6 + $0x18] sm:$0xff] (!%p811_p7), %vm254_vm1, %v996_v1 }
  0x15   : > { %259 = vst.msk [vmem:[%s1066_s6 + $0x20] sm:$0xff] (!%p811_p7), %vm254_vm1, %v996_v1  ;;  %260 = vst.msk [vmem:[%s1066_s6 + $0x28] sm:$0xff] (!%p811_p7), %vm254_vm1, %v996_v1 }
  0x16   : > { %261 = vst.msk [vmem:[%s1066_s6 + $0x30] sm:$0xff] (!%p811_p7), %vm254_vm1, %v996_v1  ;;  %262 = vst.msk [vmem:[%s1066_s6 + $0x38] sm:$0xff] (!%p811_p7), %vm254_vm1, %v996_v1 }
  0x17   : > { %263 = vst.msk [vmem:[%s1074_s12] sm:$0xff] (!%p811_p7), %vm254_vm1, %v995_v0  ;;  %264 = vst.msk [vmem:[%s1074_s12 + $0x8] sm:$0xff] (!%p811_p7), %vm254_vm1, %v995_v0 }
  0x18   : > { %265 = vst.msk [vmem:[%s1074_s12 + $0x10] sm:$0xff] (!%p811_p7), %vm254_vm1, %v995_v0  ;;  %266 = vst.msk [vmem:[%s1074_s12 + $0x18] sm:$0xff] (!%p811_p7), %vm254_vm1, %v995_v0 }
  0x19   : > { %267 = vst.msk [vmem:[%s1074_s12 + $0x20] sm:$0xff] (!%p811_p7), %vm254_vm1, %v995_v0  ;;  %268 = vst.msk [vmem:[%s1074_s12 + $0x28] sm:$0xff] (!%p811_p7), %vm254_vm1, %v995_v0 }
  0x1a   : > { %269 = vst.msk [vmem:[%s1074_s12 + $0x30] sm:$0xff] (!%p811_p7), %vm254_vm1, %v995_v0  ;;  %270 = vst.msk [vmem:[%s1074_s12 + $0x38] sm:$0xff] (!%p811_p7), %vm254_vm1, %v995_v0 }
  0x1b PF: > { %v279_v2 = vld [vmem:[%s230_s9] sm:$0xff]   ;;  %vm306_vm2 = vcmask 261120   ;;  %s822_s15 = sshll.u32 %s1055_s23, 4  ;;  %v899_v4 = vld [vmem:[%s1254_s0 + $0x10] sm:$0xff]   ;;  %v900_v9 = vld [vmem:[%s1254_s0 + $0x8] sm:$0xff]   ;;  %vm408_vm3 = vcmask 130048  }
  0x1c   : > { %v898_v3 = vld [vmem:[%s1254_s0] sm:$0xff]   ;;  %s390_s24 = sshra.s32 %s822_s15, 3  ;;  %849 = vmatprep.subr.msk.bf16.mxu0 %vm306_vm2, %v279_v2  ;;  %850 = vmatprep.subr.msk.bf16.mxu1 %vm306_vm2, %v279_v2  ;;  %v320_v5 = vsel %vm306_vm2, %v279_v2, 0  ;;  %v398_v6 = vunpack.c.l.bf16 %v279_v2  ;;  %v399_v7 = vunpack.c.h.bf16 %v279_v2  ;;  %v901_v10 = vld [vmem:[%s1254_s0 + $0x18] sm:$0xff]   ;;  %vm490_vm4 = vcmask 7168  }
  0x1d   : > { %838 = vmatpush3.bf16.xpose.msra.mxu0 %v320_v5  ;;  %848 = vmatpush3.bf16.xpose.msra.mxu1 %v320_v5  ;;  %s823_s25 = sshll.u32 %s390_s24, 2  ;;  %vm479_vm5 = vcmask 122880   ;;  %vm507_vm6 = vcmask 0  }
  0x1e   : > { %839 = vmatprep.mubr.msk.bf16.mxu0 %vm306_vm2, %v898_v3  ;;  %843 = vmatprep.mubr.msk.bf16.mxu1 %vm306_vm2, %v899_v4  ;;  %s393_s28 = scalar_lea.vmem %s1254_s0, %s823_s25 }
  0x1f   : > { %v829_v8 = vld [vmem:[%s393_s28] sm:$0xff]  }
  0x20   : > { %v830_v11 = vunpack.c.l.bf16 %v829_v8  ;;  %v831_v12 = vunpack.c.h.bf16 %v829_v8 }
  0x22   : > { %v400_v13 = vmul.f32 %v830_v11, %v398_v6  ;;  %v401_v14 = vmul.f32 %v831_v12, %v399_v7 }
  0x24   : > { %840 = vmatmul.mubr.msk.bf16.vlgmr.msra.gmra.mrb[0].mxu0 %vm306_vm2, %v900_v9  ;;  %844 = vmatmul.mubr.msk.bf16.vlgmr.msra.gmra.mrb[0].mxu1 %vm306_vm2, %v901_v10  ;;  %v402_v15 = vsel %vm306_vm2, %v400_v13, 0.0  ;;  %v405_v16 = vsel %vm306_vm2, %v401_v14, 0.0 }
  0x25   : > { %403 = vadd.xlane.f32.xlu0 %v402_v15 }
  0x29   : > { %406 = vadd.xlane.f32.xlu0 %v405_v16 }
  0xf7   : > { %v841_v17 = vpop.f32.mrb[0].mxu0  ;;  %v845_v18 = vpop.f32.mrb[0].mxu1 }
  0xf8   : > { %v411_v19 = vsel %vm408_vm3, %v841_v17, -inf  ;;  %v417_v20 = vsel %vm408_vm3, %v845_v18, -inf  ;;  %v356_v21 = vpop.f32.mrb[1].mxu0  ;;  %v372_v22 = vpop.f32.mrb[1].mxu1 }
  0xf9   : > { %v418_v23 = vmax.f32 %v411_v19, %v417_v20  ;;  %v413_v24 = vsel %vm408_vm3, %v372_v22, -inf  ;;  %v842_v25 = vpop.f32.mrb[2].mxu0  ;;  %v846_v26 = vpop.f32.mrb[2].mxu1  ;;  %v409_v27 = vsel %vm408_vm3, %v356_v21, -inf }
  0xfa   : > { %v1140_v28 = vsel %vm408_vm3, %v842_v25, -inf  ;;  %v1143_v29 = vsel %vm408_vm3, %v846_v26, -inf  ;;  %v375_v30 = vpop.f32.mrb[3].mxu1  ;;  %517 = vmax.xlane.f32.xlu0 %v409_v27  ;;  %v414_v31 = vmax.f32 %v409_v27, %v413_v24  ;;  %v359_v32 = vpop.f32.mrb[3].mxu0 }
  0xfb   : > { %v420_v33 = vmax.f32 %v1140_v28, %v1143_v29  ;;  %v1148_v34 = vsel %vm408_vm3, %v375_v30, -inf  ;;  %v1151_v35 = vsel %vm408_vm3, %v359_v32, -inf }
  0xfc   : > { %v416_v36 = vmax.f32 %v1151_v35, %v1148_v34 }
  0xfd   : > { %v422_v37 = vmax.f32 %v418_v23, %v420_v33 }
  0xfe   : > { %v421_v38 = vmax.f32 %v414_v31, %v416_v36  ;;  %521 = vmax.xlane.f32.xlu0 %v411_v19 }
 0x100   : > { %v423_v39 = vmax.f32 %v421_v38, %v422_v37 }
 0x102   : > { %v424_v40 = vrot.slane %v423_v39, 4  ;;  %525 = vmax.xlane.f32.xlu0 %v413_v24 }
 0x104   : > { %v425_v41 = vmax.f32 %v423_v39, %v424_v40 }
 0x106   : > { %v426_v42 = vrot.slane %v425_v41, 2  ;;  %529 = vmax.xlane.f32.xlu0 %v417_v20 }
 0x108   : > { %v427_v43 = vmax.f32 %v425_v41, %v426_v42 }
 0x10a   : > { %v428_v44 = vrot.slane %v427_v43, 1 }
 0x10c   : > { %v1155_v45 = vmax.f32 %v427_v43, %v428_v44 }
 0x10e   : > { %v430_v46 = vsub.f32 %v356_v21, %v1155_v45  ;;  %v431_v47 = vsub.f32 %v359_v32, %v1155_v45  ;;  %v541_v48 = vmul.f32 1.442695, %v1155_v45  ;;  %v432_v49 = vsub.f32 %v841_v17, %v1155_v45 }
 0x10f   : > { %v434_v50 = vsub.f32 %v372_v22, %v1155_v45  ;;  %v436_v51 = vsub.f32 %v845_v18, %v1155_v45  ;;  %v433_v52 = vsub.f32 %v842_v25, %v1155_v45  ;;  %v435_v53 = vsub.f32 %v375_v30, %v1155_v45 }
 0x110   : > { %v438_v54 = vmul.f32 1.442695, %v430_v46  ;;  %v440_v55 = vmul.f32 1.442695, %v431_v47  ;;  %v442_v56 = vmul.f32 1.442695, %v432_v49  ;;  %903 = vpow2.f32 %v541_v48 }
 0x111   : > { %v446_v57 = vmul.f32 1.442695, %v434_v50  ;;  %v437_v58 = vsub.f32 %v846_v26, %v1155_v45  ;;  %v450_v59 = vmul.f32 1.442695, %v436_v51  ;;  %v444_v60 = vmul.f32 1.442695, %v433_v52  ;;  %v404_v50 = vpop.xlane.xlu0 %403 }
 0x112   : > { %905 = vpow2.f32 %v438_v54  ;;  %v448_v61 = vmul.f32 1.442695, %v435_v53 }
 0x113   : > { %907 = vpow2.f32 %v440_v55  ;;  %v452_v62 = vmul.f32 1.442695, %v437_v58  ;;  %v491_v55 = vsel %vm490_vm4, %v404_v50, 0.0 }
 0x114   : > { %909 = vpow2.f32 %v442_v56 }
 0x115   : > { %911 = vpow2.f32 %v446_v57  ;;  %v407_v53 = vpop.xlane.xlu0 %406 }
 0x116   : > { %913 = vpow2.f32 %v450_v59  ;;  %v492_v56 = vsel %vm490_vm4, %v407_v53, 0.0 }
 0x117   : > { %915 = vpow2.f32 %v444_v60  ;;  %v493_v58 = vadd.f32 %v492_v56, %v491_v55 }
 0x118   : > { %917 = vpow2.f32 %v448_v61  ;;  %v511_v61 = vld [vmem:[%s1066_s6 + $0x10] sm:$0xff] }
 0x119   : > { %919 = vpow2.f32 %v452_v62 }
 0x11a   : > { %v904_v63 = vpop.eup %903 }
 0x11c   : > { %v906_v0 = vpop.eup %905 }
 0x11d   : > { %v908_v1 = vpop.eup %907  ;;  %v454_v2 = vsel %vm408_vm3, %v906_v0, 0.0  ;;  %v543_v3 = vmul.f32 %v906_v0, %v904_v63 }
 0x11e   : > { %v910_v4 = vpop.eup %909  ;;  %v455_v5 = vsel %vm408_vm3, %v908_v1, 0.0  ;;  %v544_v6 = vmul.f32 %v908_v1, %v904_v63 }
 0x11f   : > { %v912_v7 = vpop.eup %911  ;;  %v456_v8 = vadd.f32 %v455_v5, %v454_v2  ;;  %v551_v9 = vsel %vm408_vm3, %v543_v3, 0.0  ;;  %v545_v10 = vmul.f32 %v910_v4, %v904_v63  ;;  %v457_v13 = vsel %vm408_vm3, %v910_v4, 0.0 }
 0x120   : > { %v914_v11 = vpop.eup %913  ;;  %552 = vadd.xlane.f32.xlu0 %v551_v9  ;;  %v547_v12 = vmul.f32 %v912_v7, %v904_v63  ;;  %v554_v14 = vsel %vm408_vm3, %v544_v6, 0.0  ;;  %v461_v25 = vsel %vm408_vm3, %v912_v7, 0.0 }
 0x121   : > { %v916_v15 = vpop.eup %915  ;;  %v549_v16 = vmul.f32 %v914_v11, %v904_v63  ;;  %v458_v17 = vadd.f32 %v457_v13, %v456_v8  ;;  %v557_v22 = vsel %vm408_vm3, %v545_v10, 0.0  ;;  %v465_v38 = vsel %vm408_vm3, %v914_v11, 0.0 }
 0x122   : > { %v918_v18 = vpop.eup %917  ;;  %v459_v19 = vsel %vm408_vm3, %v916_v15, 0.0  ;;  %v546_v20 = vmul.f32 %v916_v15, %v904_v63  ;;  %v563_v36 = vsel %vm408_vm3, %v547_v12, 0.0 }
 0x123   : > { %v920_v21 = vpop.eup %919  ;;  %v460_v23 = vadd.f32 %v459_v19, %v458_v17  ;;  %v548_v24 = vmul.f32 %v918_v18, %v904_v63  ;;  %v463_v32 = vsel %vm408_vm3, %v918_v18, 0.0  ;;  %v569_v41 = vsel %vm408_vm3, %v549_v16, 0.0  ;;  %v607_v19 = vld [vmem:[%s1074_s12] sm:$0xff] }
 0x124   : > { %558 = vadd.xlane.f32.xlu0 %v557_v22  ;;  %v560_v26 = vsel %vm408_vm3, %v546_v20, 0.0  ;;  %v550_v27 = vmul.f32 %v920_v21, %v904_v63  ;;  %v467_v40 = vsel %vm408_vm3, %v920_v21, 0.0  ;;  %v515_v63 = vld [vmem:[%s1066_s6 + $0x30] sm:$0xff] }
 0x125   : > { %v462_v30 = vadd.f32 %v461_v25, %v460_v23  ;;  %v566_v31 = vsel %vm408_vm3, %v548_v24, 0.0  ;;  %v609_v25 = vld [vmem:[%s1074_s12 + $0x10] sm:$0xff] }
 0x126   : > { %v572_v33 = vsel %vm408_vm3, %v550_v27, 0.0 }
 0x127   : > { %v464_v37 = vadd.f32 %v463_v32, %v462_v30 }
 0x128   : > { %564 = vadd.xlane.f32.xlu0 %v563_v36  ;;  %v611_v36 = vld [vmem:[%s1074_s12 + $0x20] sm:$0xff] }
 0x129   : > { %v466_v39 = vadd.f32 %v465_v38, %v464_v37 }
 0x12b   : > { %v468_v42 = vadd.f32 %v467_v40, %v466_v39 }
 0x12c   : > { %570 = vadd.xlane.f32.xlu0 %v569_v41 }
 0x12d   : > { %v469_v43 = vrot.slane %v468_v42, 4 }
 0x12f   : > { %v470_v44 = vadd.f32 %v469_v43, %v468_v42  ;;  %v613_v43 = vld [vmem:[%s1074_s12 + $0x30] sm:$0xff] }
 0x131   : > { %v471_v46 = vrot.slane %v470_v44, 2 }
 0x133   : > { %v472_v47 = vadd.f32 %v471_v46, %v470_v44 }
 0x135   : > { %v473_v48 = vrot.slane %v472_v47, 1 }
 0x137   : > { %v474_v49 = vadd.f32 %v473_v48, %v472_v47 }
 0x139   : > { %921 = vlog2.f32 %v474_v49 }
 0x143   : > { %v922_v51 = vpop.eup %921 }
 0x144   : > { %v476_v52 = vmul.f32 0.6931472, %v922_v51 }
 0x146   : > { %v477_v54 = vadd.f32 %v476_v52, %v1155_v45  ;;  %v509_v45 = vld [vmem:[%s1066_s6] sm:$0xff] }
 0x148   : > { %v480_v57 = vsel %vm479_vm5, %v477_v54, 0.0 }
 0x149   : > { %481 = vadd.xlane.f32.xlu1 %v480_v57  ;;  %v510_v57 = vld [vmem:[%s1066_s6 + $0x8] sm:$0xff] }
 0x14d   : > { %494 = vadd.xlane.f32.xlu1 %v493_v58 }
 0x151   : > { %519 = vmax.xlane.f32.xlu1 %v1151_v35 }
 0x155   : > { %523 = vmax.xlane.f32.xlu1 %v1140_v28  ;;  %v513_v28 = vld [vmem:[%s1066_s6 + $0x20] sm:$0xff] }
 0x159   : > { %527 = vmax.xlane.f32.xlu1 %v1148_v34 }
 0x15d   : > { %531 = vmax.xlane.f32.xlu1 %v1143_v29 }
 0x161   : > { %555 = vadd.xlane.f32.xlu1 %v554_v14 }
 0x165   : > { %561 = vadd.xlane.f32.xlu1 %v560_v26 }
 0x169   : > { %567 = vadd.xlane.f32.xlu1 %v566_v31 }
 0x16d   : > { %573 = vadd.xlane.f32.xlu1 %v572_v33 }
 0x187   : > { %v518_v59 = vpop.xlane.xlu0 %517 }
 0x188   : > { %v533_v60 = vmax.f32 %v509_v45, %v518_v59 }
 0x18a   : > { %663 = vst.msk [vmem:[%s1066_s6] sm:$0xff] %vm490_vm4, %v533_v60  ;;  %v615_v2 = vsub.f32 %v509_v45, %v533_v60  ;;  %v575_v3 = vsub.f32 0.0, %v533_v60 }
 0x18b   : > { %v522_v35 = vpop.xlane.xlu0 %521 }
 0x18c   : > { %v535_v62 = vmax.f32 %v511_v61, %v522_v35  ;;  %v623_v4 = vmul.f32 1.442695, %v615_v2  ;;  %v583_v6 = vmul.f32 1.442695, %v575_v3 }
 0x18e   : > { %665 = vst.msk [vmem:[%s1066_s6 + $0x10] sm:$0xff] %vm490_vm4, %v535_v62  ;;  %v617_v5 = vsub.f32 %v511_v61, %v535_v62  ;;  %v577_v7 = vsub.f32 0.0, %v535_v62  ;;  %923 = vpow2.f32 %v623_v4  ;;  %v512_v62 = vld [vmem:[%s1066_s6 + $0x18] sm:$0xff] }
 0x18f   : > { %v526_v34 = vpop.xlane.xlu0 %525  ;;  %925 = vpow2.f32 %v583_v6 }
 0x190   : > { %v537_v29 = vmax.f32 %v513_v28, %v526_v34  ;;  %v627_v8 = vmul.f32 1.442695, %v617_v5  ;;  %v587_v10 = vmul.f32 1.442695, %v577_v7  ;;  %v514_v5 = vld [vmem:[%s1066_s6 + $0x28] sm:$0xff] }
 0x192   : > { %667 = vst.msk [vmem:[%s1066_s6 + $0x20] sm:$0xff] %vm490_vm4, %v537_v29  ;;  %v619_v9 = vsub.f32 %v513_v28, %v537_v29  ;;  %v579_v11 = vsub.f32 0.0, %v537_v29  ;;  %927 = vpow2.f32 %v627_v8 }
 0x193   : > { %v530_v0 = vpop.xlane.xlu0 %529  ;;  %929 = vpow2.f32 %v587_v10 }
 0x194   : > { %v539_v1 = vmax.f32 %v515_v63, %v530_v0  ;;  %v631_v12 = vmul.f32 1.442695, %v619_v9  ;;  %v591_v14 = vmul.f32 1.442695, %v579_v11 }
 0x196   : > { %669 = vst.msk [vmem:[%s1066_s6 + $0x30] sm:$0xff] %vm490_vm4, %v539_v1  ;;  %v621_v13 = vsub.f32 %v515_v63, %v539_v1  ;;  %v581_v15 = vsub.f32 0.0, %v539_v1  ;;  %931 = vpow2.f32 %v631_v12 }
 0x197   : > { %933 = vpow2.f32 %v591_v14 }
 0x198   : > { %v635_v16 = vmul.f32 1.442695, %v621_v13  ;;  %v924_v17 = vpop.eup %923  ;;  %v595_v18 = vmul.f32 1.442695, %v581_v15  ;;  %v516_v13 = vld [vmem:[%s1066_s6 + $0x38] sm:$0xff] }
 0x199   : > { %v926_v20 = vpop.eup %925  ;;  %v639_v22 = vmul.f32 %v924_v17, %v607_v19 }
 0x19a   : > { %935 = vpow2.f32 %v635_v16 }
 0x19b   : > { %937 = vpow2.f32 %v595_v18 }
 0x19c   : > { %v928_v24 = vpop.eup %927 }
 0x19d   : > { %v930_v27 = vpop.eup %929  ;;  %v641_v31 = vmul.f32 %v928_v24, %v609_v25 }
 0x1a0   : > { %v932_v33 = vpop.eup %931 }
 0x1a1   : > { %v934_v38 = vpop.eup %933  ;;  %v643_v40 = vmul.f32 %v932_v33, %v611_v36 }
 0x1a4   : > { %v936_v42 = vpop.eup %935 }
 0x1a5   : > { %v938_v46 = vpop.eup %937  ;;  %v645_v48 = vmul.f32 %v936_v42, %v613_v43 }
 0x1ad   : > { %v553_v21 = vpop.xlane.xlu0 %552 }
 0x1ae   : > { %v599_v23 = vmul.f32 %v926_v20, %v553_v21 }
 0x1b0   : > { %v647_v26 = vadd.f32 %v639_v22, %v599_v23  ;;  %v608_v22 = vld [vmem:[%s1074_s12 + $0x8] sm:$0xff] }
 0x1b1   : > { %v559_v30 = vpop.xlane.xlu0 %558 }
 0x1b2   : > { %655 = vst.msk [vmem:[%s1074_s12] sm:$0xff] %vm490_vm4, %v647_v26  ;;  %v601_v32 = vmul.f32 %v930_v27, %v559_v30 }
 0x1b4   : > { %v649_v37 = vadd.f32 %v641_v31, %v601_v32  ;;  %v610_v32 = vld [vmem:[%s1074_s12 + $0x18] sm:$0xff] }
 0x1b5   : > { %v565_v39 = vpop.xlane.xlu0 %564 }
 0x1b6   : > { %657 = vst.msk [vmem:[%s1074_s12 + $0x10] sm:$0xff] %vm490_vm4, %v649_v37  ;;  %v603_v41 = vmul.f32 %v934_v38, %v565_v39 }
 0x1b8   : > { %v651_v44 = vadd.f32 %v643_v40, %v603_v41  ;;  %v612_v41 = vld [vmem:[%s1074_s12 + $0x28] sm:$0xff] }
 0x1b9   : > { %v571_v47 = vpop.xlane.xlu0 %570 }
 0x1ba   : > { %659 = vst.msk [vmem:[%s1074_s12 + $0x20] sm:$0xff] %vm490_vm4, %v651_v44  ;;  %v605_v49 = vmul.f32 %v938_v46, %v571_v47 }
 0x1bc   : > { %v653_v50 = vadd.f32 %v645_v48, %v605_v49  ;;  %v614_v49 = vld [vmem:[%s1074_s12 + $0x38] sm:$0xff] }
 0x1be   : > { %661 = vst.msk [vmem:[%s1074_s12 + $0x30] sm:$0xff] %vm490_vm4, %v653_v50 }
 0x1d6   : > { %v482_v51 = vpop.xlane.xlu1 %481 }
 0x1d7   : > { %v483_v52 = vrot.slane %v482_v51, 4 }
 0x1d9   : > { %v484_v53 = vadd.f32 %v483_v52, %v482_v51 }
 0x1da   : > { %v495_v54 = vpop.xlane.xlu1 %494 }
 0x1db   : > { %v485_v55 = vrot.slane %v484_v53, 2  ;;  %v496_v56 = vrot.slane %v495_v54, 4 }
 0x1dd   : > { %v497_v58 = vadd.f32 %v496_v56, %v495_v54  ;;  %v486_v45 = vadd.f32 %v485_v55, %v484_v53 }
 0x1de   : > { %v520_v59 = vpop.xlane.xlu1 %519 }
 0x1df   : > { %v498_v60 = vrot.slane %v497_v58, 2  ;;  %v534_v61 = vmax.f32 %v510_v57, %v520_v59  ;;  %v487_v35 = vrot.slane %v486_v45, 1 }
 0x1e1   : > { %v576_v28 = vsub.f32 0.0, %v534_v61  ;;  %v616_v34 = vsub.f32 %v510_v57, %v534_v61  ;;  %664 = vst.msk [vmem:[%s1066_s6 + $0x8] sm:$0xff] %vm490_vm4, %v534_v61  ;;  %v488_v29 = vadd.f32 %v487_v35, %v486_v45  ;;  %v499_v63 = vadd.f32 %v498_v60, %v497_v58  ;;  %v478_v57 = vld [vmem:[%s1061_s27] sm:$0x1] }
 0x1e2   : > { %v524_v0 = vpop.xlane.xlu1 %523 }
 0x1e3   : > { %v585_v1 = vmul.f32 1.442695, %v576_v28  ;;  %v625_v2 = vmul.f32 1.442695, %v616_v34  ;;  %v536_v3 = vmax.f32 %v512_v62, %v524_v0  ;;  %851 = vpush %v488_v29  ;;  %v500_v4 = vrot.slane %v499_v63, 1 }
 0x1e5   : > { %939 = vpow2.f32 %v585_v1  ;;  %v578_v6 = vsub.f32 0.0, %v536_v3  ;;  %v618_v7 = vsub.f32 %v512_v62, %v536_v3  ;;  %666 = vst.msk [vmem:[%s1066_s6 + $0x18] sm:$0xff] %vm490_vm4, %v536_v3  ;;  %v501_v8 = vadd.f32 %v500_v4, %v499_v63 }
 0x1e6   : > { %941 = vpow2.f32 %v625_v2  ;;  %v528_v9 = vpop.xlane.xlu1 %527 }
 0x1e7   : > { %v589_v10 = vmul.f32 1.442695, %v578_v6  ;;  %v629_v11 = vmul.f32 1.442695, %v618_v7  ;;  %v538_v12 = vmax.f32 %v514_v5, %v528_v9  ;;  %853 = vpush %v501_v8 }
 0x1e9   : > { %943 = vpow2.f32 %v589_v10  ;;  %v580_v14 = vsub.f32 0.0, %v538_v12  ;;  %v620_v15 = vsub.f32 %v514_v5, %v538_v12  ;;  %668 = vst.msk [vmem:[%s1066_s6 + $0x28] sm:$0xff] %vm490_vm4, %v538_v12 }
 0x1ea   : > { %945 = vpow2.f32 %v629_v11  ;;  %v532_v16 = vpop.xlane.xlu1 %531 }
 0x1eb   : > { %v593_v17 = vmul.f32 1.442695, %v580_v14  ;;  %v633_v18 = vmul.f32 1.442695, %v620_v15  ;;  %v540_v19 = vmax.f32 %v516_v13, %v532_v16 }
 0x1ed   : > { %947 = vpow2.f32 %v593_v17  ;;  %v582_v20 = vsub.f32 0.0, %v540_v19  ;;  %v622_v21 = vsub.f32 %v516_v13, %v540_v19  ;;  %670 = vst.msk [vmem:[%s1066_s6 + $0x38] sm:$0xff] %vm490_vm4, %v540_v19 }
 0x1ee   : > { %949 = vpow2.f32 %v633_v18  ;;  %v556_v23 = vpop.xlane.xlu1 %555 }
 0x1ef   : > { %v940_v24 = vpop.eup %939  ;;  %v597_v25 = vmul.f32 1.442695, %v582_v20  ;;  %v637_v26 = vmul.f32 1.442695, %v622_v21 }
 0x1f0   : > { %v942_v27 = vpop.eup %941  ;;  %v600_v30 = vmul.f32 %v940_v24, %v556_v23 }
 0x1f1   : > { %951 = vpow2.f32 %v597_v25  ;;  %v640_v31 = vmul.f32 %v942_v27, %v608_v22 }
 0x1f2   : > { %953 = vpow2.f32 %v637_v26  ;;  %v562_v33 = vpop.xlane.xlu1 %561 }
 0x1f3   : > { %v944_v36 = vpop.eup %943  ;;  %v648_v37 = vadd.f32 %v640_v31, %v600_v30 }
 0x1f4   : > { %v946_v38 = vpop.eup %945  ;;  %v602_v39 = vmul.f32 %v944_v36, %v562_v33 }
 0x1f5   : > { %656 = vst.msk [vmem:[%s1074_s12 + $0x8] sm:$0xff] %vm490_vm4, %v648_v37  ;;  %v642_v40 = vmul.f32 %v946_v38, %v610_v32 }
 0x1f6   : > { %v568_v42 = vpop.xlane.xlu1 %567 }
 0x1f7   : > { %v948_v43 = vpop.eup %947  ;;  %v650_v44 = vadd.f32 %v642_v40, %v602_v39 }
 0x1f8   : > { %v950_v46 = vpop.eup %949  ;;  %v604_v47 = vmul.f32 %v948_v43, %v568_v42 }
 0x1f9   : > { %658 = vst.msk [vmem:[%s1074_s12 + $0x18] sm:$0xff] %vm490_vm4, %v650_v44  ;;  %v644_v48 = vmul.f32 %v950_v46, %v612_v41 }
 0x1fa   : > { %v574_v50 = vpop.xlane.xlu1 %573 }
 0x1fb   : > { %v952_v51 = vpop.eup %951  ;;  %v652_v52 = vadd.f32 %v644_v48, %v604_v47 }
 0x1fc   : > { %v954_v53 = vpop.eup %953  ;;  %v606_v54 = vmul.f32 %v952_v51, %v574_v50 }
 0x1fd   : > { %660 = vst.msk [vmem:[%s1074_s12 + $0x28] sm:$0xff] %vm490_vm4, %v652_v52  ;;  %v646_v55 = vmul.f32 %v954_v53, %v614_v49 }
 0x1ff   : > { %v654_v56 = vadd.f32 %v646_v55, %v606_v54 }
 0x201   : > { %662 = vst.msk [vmem:[%s1074_s12 + $0x38] sm:$0xff] %vm490_vm4, %v654_v56 }
 0x214   : > { %s852_s6 = spop %851 }
 0x218   : > { %s854_s8 = spop %853 }
 0x219   : > { %s503_s9 = smul.f32 2.0, %s854_s8 }
 0x21b   : > { %s504_s10 = ssub.f32 %s852_s6, %s503_s9 }
 0x21d   : > { %v505_v58 = vstv %s504_s10 }
 0x21e   : > { %v506_v45 = vadd.f32 %v505_v58, %v478_v57 }
 0x220   : > { %508 = vst.msk [vmem:[%s1061_s27] sm:$0x1] %vm507_vm6, %v506_v45 }
 0x221 PF: > { %s15_s19 = sadd.s32 1, %s993_s19   ;;  %s1259_s15 = smov %s985_s17 }
 0x222   : > { %p12_p8 = scmp.ge.s32.totalorder %s15_s19, 6   ;;  %s1260_s16 = smov %s989_s18 }
 0x223   : > { %s1261_s17 = smov %s1264_s20  ;;  %s1262_s18 = smov %s1268_s21 }
 0x224   :  { %14 = sbr.rel (!%p12_p8) target bundleno = 3 (0x3), region = 87 }

</bundles_post_ra>
